<compile_context>
chip_gen: v7x
topology: tpu7x:2x2x1
jax: 0.10.0
libtpu: 0.0.40
codegen_flags: <defaults>
</compile_context>

<pallas_src>
import functools

import jax
import jax.numpy as jnp
from jax import lax
from jax.experimental import pallas as pl
from jax.experimental.pallas import tpu as pltpu


def _round_up(x, m):
    return ((x + m - 1) // m) * m


def _avg_voxelize_kernel(feat_ref, idx_ref, out_ref, *, c, tv):
    # feat_ref: (1, Cp, tN)  features with a ones-row at row `c`, zero-padded rows/cols.
    # idx_ref:  (1, 1, tN)   int32 flat voxel index per point (-1 for padded points).
    # out_ref:  (1, Cp, tv)  f32 resident accumulator == final output block.
    j = pl.program_id(1)
    kn = pl.program_id(2)

    @pl.when(kn == 0)
    def _():
        out_ref[...] = jnp.zeros_like(out_ref)

    feat = feat_ref[0]                                        # (Cp, tN)
    idx = idx_ref[0]                                          # (1, tN) int32

    # Local one-hot for this voxel block: a (tv, 1) column iota offset by j*tv,
    # broadcast-compared against the (1, tN) index row (no full 2-D iota rebuild).
    iota_col = lax.broadcasted_iota(jnp.int32, (tv, 1), 0) + j * tv
    onehot_t = (iota_col == idx).astype(feat.dtype)           # (tv, tN), exact 0/1

    # Fused sums + counts: single MXU pass per chunk, f32 accumulation in place.
    out_ref[0] += lax.dot_general(
        feat, onehot_t, (((1,), (1,)), ((), ())),
        preferred_element_type=jnp.float32)                   # (Cp, tv)

    @pl.when(kn == pl.num_programs(2) - 1)
    def _():
        acc = out_ref[0]                                      # (Cp, tv)
        cnt = jnp.maximum(acc[c:c + 1, :], 1.0)               # (1, tv) counts row
        inv = pl.reciprocal(cnt, approx=True)                 # EUP path
        inv = inv * (2.0 - cnt * inv)                         # one Newton step
        out_ref[0] = acc * inv


def avg_voxelization(features, coords, resolution, normalize=True, eps=0.0,
                     chunk_n=None, voxel_block=None, vmem_limit_bytes=None):
    """features: (B, C, N), coords: (B, 3, N).
    Returns (voxel_grid (B, C, r, r, r), norm_coords (B, 3, N))."""
    B, C, N = features.shape
    r = int(resolution)
    R3 = r * r * r

    # ---- coordinate normalization (cheap elementwise prologue, stays in XLA) ----
    coords_f = coords.astype(jnp.float32)
    nc = coords_f - jnp.mean(coords_f, axis=2, keepdims=True)
    if normalize:
        denom = jnp.max(jnp.linalg.norm(nc, axis=1, keepdims=True),
                        axis=2, keepdims=True) * 2.0 + eps
        # NOTE: matches the torch module exactly -- with eps == 0 and degenerate
        # inputs (all points identical) this divides by zero, like the reference.
        nc = nc / denom + 0.5
    else:
        nc = (nc + 1.0) / 2.0
    norm_coords = jnp.clip(nc * r, 0.0, float(r - 1))                 # (B, 3, N)
    vox = jnp.round(norm_coords).astype(jnp.int32)
    idx = vox[:, 0] * (r * r) + vox[:, 1] * r + vox[:, 2]             # (B, N)

    itemsize = jnp.dtype(features.dtype).itemsize

    # ---- voxel-axis tiling -------------------------------------------------------
    if voxel_block is None:
        tv = min(8192, _round_up(R3, 128))
    else:
        tv = max(128, (int(voxel_block) // 128) * 128)
    r3_pad = _round_up(max(R3, 128), tv)
    nj = r3_pad // tv

    # ---- N-axis tiling (big chunks; bound the (tv, tn) one-hot tile) -------------
    if chunk_n is None:
        budget = 6 * 1024 * 1024
        tn = (budget // (tv * itemsize)) // 256 * 256
        tn = max(256, min(2048, tn))
    else:
        tn = max(128, (int(chunk_n) // 128) * 128)
    tn = min(tn, _round_up(N, 128))
    n_pad = _round_up(N, tn)
    nk = n_pad // tn

    # ---- pad / extend operands ----------------------------------------------------
    cp = _round_up(C + 1, 8)   # feature rows + ones (counts) row, padded to 8 sublanes
    feat_ext = jnp.concatenate(
        [features, jnp.ones((B, 1, N), features.dtype)], axis=1)       # (B, C+1, N)
    feat_ext = jnp.pad(feat_ext, ((0, 0), (0, cp - (C + 1)), (0, n_pad - N)))
    idx_p = jnp.pad(idx[:, None, :], ((0, 0), (0, 0), (0, n_pad - N)),
                    constant_values=-1)                                # (B, 1, n_pad)

    kernel = functools.partial(_avg_voxelize_kernel, c=C, tv=tv)

    # VMEM budget from actual tile sizes; clamp well under v7x's 64 MiB physical VMEM.
    if vmem_limit_bytes is None:
        est = (2 * cp * tv * 4                   # resident f32 output block (+ buffer)
               + 2 * cp * tn * itemsize          # double-buffered features
               + 2 * 8 * tn * 4                  # double-buffered indices (sublane pad)
               + 2 * tv * tn * itemsize          # materialized one-hot
               + (4 << 20))                      # headroom
        vmem_limit_bytes = int(min(48 << 20, max(16 << 20, est)))

    cost = pl.CostEstimate(
        flops=2 * B * cp * r3_pad * n_pad,
        transcendentals=B * nj * tv,
        bytes_accessed=B * (nj * (cp * n_pad * itemsize + n_pad * 4)
                            + cp * r3_pad * 4))

    out = pl.pallas_call(
        kernel,
        out_shape=jax.ShapeDtypeStruct((B, cp, r3_pad), jnp.float32),
        grid_spec=pltpu.PrefetchScalarGridSpec(
            num_scalar_prefetch=0,
            grid=(B, nj, nk),
            in_specs=[
                pl.BlockSpec((1, cp, tn), lambda b, j, k: (b, 0, k)),   # feat_ext
                pl.BlockSpec((1, 1, tn), lambda b, j, k: (b, 0, k)),    # voxel idx
            ],
            out_specs=pl.BlockSpec((1, cp, tv), lambda b, j, k: (b, 0, j)),
        ),
        compiler_params=pltpu.CompilerParams(
            dimension_semantics=("parallel", "parallel", "arbitrary"),
            vmem_limit_bytes=vmem_limit_bytes),
        cost_estimate=cost,
    )(feat_ext, idx_p)

    vox_grid = out[:, :C, :R3].reshape(B, C, r, r, r).astype(features.dtype)
    return vox_grid, norm_coords


def _reference(features, coords, r, normalize=True, eps=0.0):
    """Pure-JAX reference reproducing the PyTorch semantics."""
    coords = coords.astype(jnp.float32)
    nc = coords - coords.mean(axis=2, keepdims=True)
    if normalize:
        denom = jnp.max(jnp.linalg.norm(nc, axis=1, keepdims=True),
                        axis=2, keepdims=True) * 2.0 + eps
        nc = nc / denom + 0.5
    else:
        nc = (nc + 1.0) / 2.0
    nc = jnp.clip(nc * r, 0.0, r - 1.0)
    vox = jnp.round(nc).astype(jnp.int32)
    idx = vox[:, 0] * r * r + vox[:, 1] * r + vox[:, 2]                # (B, N)
    onehot = jax.nn.one_hot(idx, r ** 3, dtype=jnp.float32)            # (B, N, R3)
    sums = jnp.einsum('bcn,bnv->bcv', features.astype(jnp.float32), onehot,
                      precision=jax.lax.Precision.HIGHEST)
    counts = onehot.sum(axis=1)[:, None, :]
    out = sums / jnp.maximum(counts, 1.0)
    B, C, _ = features.shape
    return out.reshape(B, C, r, r, r).astype(features.dtype), nc


if __name__ == "__main__":
    key = jax.random.PRNGKey(0)

    # Config 1: N not a multiple of the chunk (multi-chunk accumulation), J == 1.
    B, C, N, R = 2, 4, 300, 4
    kf, kc, key = jax.random.split(key, 3)
    features = jax.random.normal(kf, (B, C, N), dtype=jnp.float32)
    coords = jax.random.uniform(kc, (B, 3, N), dtype=jnp.float32,
                                minval=-1.0, maxval=1.0)
    vox, nc = avg_voxelization(features, coords, R, normalize=True, eps=0.0,
                               chunk_n=128)
    jax.block_until_ready((vox, nc))
    ref_vox, ref_nc = _reference(features, coords, R, normalize=True, eps=0.0)
    assert vox.shape == (B, C, R, R, R)
    assert nc.shape == (B, 3, N)
    assert jnp.allclose(vox, ref_vox, atol=1e-4, rtol=1e-4), \
        float(jnp.max(jnp.abs(vox - ref_vox)))
    assert jnp.allclose(nc, ref_nc, atol=1e-5, rtol=1e-5), \
        float(jnp.max(jnp.abs(nc - ref_nc)))

    # Config 2: odd C (exercises sublane padding of the counts row), B == 1, and a
    # forced small voxel block so the voxel-tiling grid axis has J > 1.
    B2, C2, N2, R2 = 1, 5, 200, 8
    kf2, kc2, key = jax.random.split(key, 3)
    features2 = jax.random.normal(kf2, (B2, C2, N2), dtype=jnp.float32)
    coords2 = jax.random.uniform(kc2, (B2, 3, N2), dtype=jnp.float32,
                                 minval=-1.0, maxval=1.0)
    vox2, nc2 = avg_voxelization(features2, coords2, R2, normalize=True, eps=0.0,
                                 chunk_n=128, voxel_block=128)
    jax.block_until_ready((vox2, nc2))
    ref_vox2, ref_nc2 = _reference(features2, coords2, R2, normalize=True, eps=0.0)
    assert vox2.shape == (B2, C2, R2, R2, R2)
    assert jnp.allclose(vox2, ref_vox2, atol=1e-4, rtol=1e-4), \
        float(jnp.max(jnp.abs(vox2 - ref_vox2)))
    assert jnp.allclose(nc2, ref_nc2, atol=1e-5, rtol=1e-5), \
        float(jnp.max(jnp.abs(nc2 - ref_nc2)))

    print("KERNEL_OK")
</pallas_src>

<mosaic_0001>
module attributes {stable_mosaic.version = 11 : i64} {
  func.func @_avg_voxelize_kernel(%arg0: i32, %arg1: i32, %arg2: i32, %arg3: memref<1x8x128xf32, #tpu.memory_space<vmem>>, %arg4: memref<1x1x128xi32, #tpu.memory_space<vmem>>, %arg5: memref<1x8x128xf32, #tpu.memory_space<vmem>>) attributes {dimension_semantics = [#tpu.dimension_semantics<parallel>, #tpu.dimension_semantics<parallel>, #tpu.dimension_semantics<arbitrary>], iteration_bounds = array<i64: 2, 1, 3>, scalar_prefetch = 0 : i64, scratch_operands = 0 : i64, tpu.core_type = #tpu.core_type<tc>, window_params = [{transform_indices = @transform_0, window_bounds = array<i64: 1, 8, 128>}, {transform_indices = @transform_1, window_bounds = array<i64: 1, 1, 128>}, {transform_indices = @transform_2, window_bounds = array<i64: 1, 8, 128>}]} {
    %c0_i32 = arith.constant 0 : i32
    %0 = arith.cmpi eq, %arg2, %c0_i32 : i32
    %1 = arith.extui %0 : i1 to i32
    %c0_i32_0 = arith.constant 0 : i32
    %2 = arith.cmpi ne, %1, %c0_i32_0 : i32
    scf.if %2 {
      %cst_13 = arith.constant 0.000000e+00 : f32
      %26 = vector.broadcast %cst_13 : f32 to vector<1x8x128xf32>
      %c0_14 = arith.constant 0 : index
      %c0_15 = arith.constant 0 : index
      %c0_16 = arith.constant 0 : index
      %27 = vector.load %arg5[%c0_14, %c0_15, %c0_16] : memref<1x8x128xf32, #tpu.memory_space<vmem>>, vector<1x8x128xf32>
      tpu.vector_store %arg5[%c0_14, %c0_15, %c0_16], %26 {strides = array<i32>} : memref<1x8x128xf32, #tpu.memory_space<vmem>>, vector<1x8x128xf32>,
    } else {
    }
    %c0 = arith.constant 0 : index
    %c0_1 = arith.constant 0 : index
    %c0_2 = arith.constant 0 : index
    %3 = vector.load %arg3[%c0, %c0_1, %c0_2] : memref<1x8x128xf32, #tpu.memory_space<vmem>>, vector<1x8x128xf32>
    %4 = vector.shape_cast %3 : vector<1x8x128xf32> to vector<8x128xf32>
    %c0_3 = arith.constant 0 : index
    %c0_4 = arith.constant 0 : index
    %c0_5 = arith.constant 0 : index
    %5 = vector.load %arg4[%c0_3, %c0_4, %c0_5] : memref<1x1x128xi32, #tpu.memory_space<vmem>>, vector<1x1x128xi32>
    %6 = vector.shape_cast %5 : vector<1x1x128xi32> to vector<1x128xi32>
    %7 = tpu.iota {dimensions = array<i32: 0>} : vector<128x1xi32>
    %c128_i32 = arith.constant 128 : i32
    %8 = arith.muli %arg1, %c128_i32 : i32
    %9 = vector.broadcast %8 : i32 to vector<128x1xi32>
    %10 = arith.addi %7, %9 : vector<128x1xi32>
    %11 = vector.broadcast %10 : vector<128x1xi32> to vector<128x128xi32>
    %12 = vector.broadcast %6 : vector<1x128xi32> to vector<128x128xi32>
    %13 = arith.cmpi eq, %11, %12 : vector<128x128xi32>
    %14 = arith.extui %13 : vector<128x128xi1> to vector<128x128xi32>
    %15 = arith.sitofp %14 : vector<128x128xi32> to vector<128x128xf32>
    %c0_6 = arith.constant 0 : index
    %c0_7 = arith.constant 0 : index
    %c0_8 = arith.constant 0 : index
    %16 = vector.load %arg5[%c0_6, %c0_7, %c0_8] : memref<1x8x128xf32, #tpu.memory_space<vmem>>, vector<1x8x128xf32>
    %17 = vector.shape_cast %16 : vector<1x8x128xf32> to vector<8x128xf32>
    %cst = arith.constant dense<0.000000e+00> : vector<8x128xf32>
    %18 = tpu.matmul %4, %15, %cst {dimension_numbers = #tpu.dot_dimension_numbers<[1], [1], [0], [0], [0, 0, 1, 0], [], []>} : vector<8x128xf32>, vector<128x128xf32>, vector<8x128xf32> -> vector<8x128xf32>
    %19 = arith.addf %17, %18 : vector<8x128xf32>
    %c0_9 = arith.constant 0 : index
    %c0_10 = arith.constant 0 : index
    %c0_11 = arith.constant 0 : index
    %20 = vector.load %arg5[%c0_9, %c0_10, %c0_11] : memref<1x8x128xf32, #tpu.memory_space<vmem>>, vector<1x8x128xf32>
    %21 = vector.shape_cast %20 : vector<1x8x128xf32> to vector<8x128xf32>
    %22 = vector.shape_cast %19 : vector<8x128xf32> to vector<1x8x128xf32>
    tpu.vector_store %arg5[%c0_9, %c0_10, %c0_11], %22 {strides = array<i32>} : memref<1x8x128xf32, #tpu.memory_space<vmem>>, vector<1x8x128xf32>,
    %c2_i32 = arith.constant 2 : i32
    %23 = arith.cmpi eq, %arg2, %c2_i32 : i32
    %24 = arith.extui %23 : i1 to i32
    %c0_i32_12 = arith.constant 0 : i32
    %25 = arith.cmpi ne, %24, %c0_i32_12 : i32
    scf.if %25 {
      %c0_13 = arith.constant 0 : index
      %c0_14 = arith.constant 0 : index
      %c0_15 = arith.constant 0 : index
      %26 = vector.load %arg5[%c0_13, %c0_14, %c0_15] : memref<1x8x128xf32, #tpu.memory_space<vmem>>, vector<1x8x128xf32>
      %27 = vector.shape_cast %26 : vector<1x8x128xf32> to vector<8x128xf32>
      %28 = vector.extract_strided_slice %27 {offsets = [4, 0], sizes = [1, 128], strides = [1, 1]} : vector<8x128xf32> to vector<1x128xf32>
      %cst_16 = arith.constant 1.000000e+00 : f32
      %29 = vector.broadcast %cst_16 : f32 to vector<1x128xf32>
      %30 = arith.maximumf %28, %29 : vector<1x128xf32>
      %31 = tpu.reciprocal %30 {approx = true} : vector<1x128xf32> -> vector<1x128xf32>
      %32 = arith.mulf %30, %31 : vector<1x128xf32>
      %cst_17 = arith.constant 2.000000e+00 : f32
      %33 = vector.broadcast %cst_17 : f32 to vector<1x128xf32>
      %34 = arith.subf %33, %32 : vector<1x128xf32>
      %35 = arith.mulf %31, %34 : vector<1x128xf32>
      %36 = vector.broadcast %35 : vector<1x128xf32> to vector<8x128xf32>
      %37 = arith.mulf %27, %36 : vector<8x128xf32>
      %c0_18 = arith.constant 0 : index
      %c0_19 = arith.constant 0 : index
      %c0_20 = arith.constant 0 : index
      %38 = vector.load %arg5[%c0_18, %c0_19, %c0_20] : memref<1x8x128xf32, #tpu.memory_space<vmem>>, vector<1x8x128xf32>
      %39 = vector.shape_cast %38 : vector<1x8x128xf32> to vector<8x128xf32>
      %40 = vector.shape_cast %37 : vector<8x128xf32> to vector<1x8x128xf32>
      tpu.vector_store %arg5[%c0_18, %c0_19, %c0_20], %40 {strides = array<i32>} : memref<1x8x128xf32, #tpu.memory_space<vmem>>, vector<1x8x128xf32>,
    } else {
    }
    return
  }
  func.func @transform_0(%arg0: i32, %arg1: i32, %arg2: i32) -> (i32, i32, i32) {
    %c0_i32 = arith.constant 0 : i32
    %c0_i32_0 = arith.constant 0 : i32
    return %arg0, %c0_i32, %arg2 : i32, i32, i32
  }
  func.func @transform_1(%arg0: i32, %arg1: i32, %arg2: i32) -> (i32, i32, i32) {
    %c0_i32 = arith.constant 0 : i32
    %c0_i32_0 = arith.constant 0 : i32
    return %arg0, %c0_i32, %arg2 : i32, i32, i32
  }
  func.func @transform_2(%arg0: i32, %arg1: i32, %arg2: i32) -> (i32, i32, i32) {
    %c0_i32 = arith.constant 0 : i32
    %c0_i32_0 = arith.constant 0 : i32
    return %arg0, %c0_i32, %arg1 : i32, i32, i32
  }
}

</mosaic_0001>

<bundles_post_ra>
// kernel: tpu_custom_call.1
= control target key start
LH: loop header
LB: loop body
LE: loop exit
PB: predicated region body
PF: predicated region fallthrough
CT: control target
= control target key end

     0   :  { %7 = vsyncpa [#allocation3], 0  ;;  %s1271_s0 = inlined_call_operand.hbm [shape: f32[2,8,384], index: 0, kind: input, shape index: {}]   ;;  %s1272_s1 = inlined_call_operand.hbm [shape: s32[2,1,384], index: 1, kind: input, shape index: {}]   ;;  %s1273_s2 = inlined_call_operand.hbm [shape: f32[2,8,128], index: 2, kind: output, shape index: {}]  }
   0x1   :  { %9 = vsyncpa [#allocation3 + $0x1], 0 }
   0x2   :  { %10 = vsyncpa [#allocation6], 0 }
   0x3   :  { %12 = vsyncpa [#allocation6 + $0x1], 0 }
   0x4   :  { %13 = vsyncpa [#allocation4], 0 }
   0x5   :  { %15 = vsyncpa [#allocation4 + $0x1], 0  ;;  %s981_s9 = smov 0   ;;  %s983_s10 = smov 0  }
   0x6   :  { %s985_s11 = smov 0   ;;  %s987_s12 = smov 0  }
   0x7   :  { %s989_s13 = smov 0   ;;  %s991_s14 = smov 0  }
   0x8   :  { %s993_s15 = smov 0   ;;  %s995_s16 = smov 0  }
   0x9   :  { %s997_s17 = smov 0   ;;  %s999_s18 = smov 0  }
   0xa   :  { %s1001_s19 = smov 0  }
   0xb LB: > { %s529_s20 = sadd.s32 4294967295, %s956_s19   ;;  %s530_s21 = sadd.s32 4294967294, %s956_s19   ;;  %s956_s19 = sphi %s1001_s19, %s21_s19   ;;  %s952_s18 = sphi %s999_s18, %s1302_s18   ;;  %s948_s17 = sphi %s997_s17, %s1301_s17   ;;  %s944_s16 = sphi %s995_s16, %s1300_s16   ;;  %s940_s15 = sphi %s993_s15, %s1299_s15   ;;  %s936_s14 = sphi %s991_s14, %s1298_s14   ;;  %s932_s13 = sphi %s989_s13, %s1297_s13   ;;  %s928_s12 = sphi %s987_s12, %s1296_s12   ;;  %s924_s11 = sphi %s985_s11, %s1295_s11   ;;  %s920_s10 = sphi %s983_s10, %s1294_s10   ;;  %s916_s9 = sphi %s981_s9, %s1293_s9  }
   0xc   : > { %s33_s22 = sadd.s32 1, %s948_s17  ;;  %s40_s23 = sadd.s32 1, %s952_s18 }
   0xd   : > { %p34_p0 = scmp.ge.s32.totalorder %s33_s22, 3  ;;  %s49_s24 = sadd.s32 1, %s936_s14 }
   0xe   : > { %p56_p1 = scmp.ne.s32.totalorder %s936_s14, %s932_s13  ;;  %p57_p2 = scmp.eq.s32.totalorder %s956_s19, 0 }
   0xf   : > { %s1304_s22 = smov (%p34_p0, %s33_s22), 0  ;;  %s1306_s23 = smov (!%p34_p0, %s40_s23), %s952_s18 }
  0x10   : > { %1278 = sst [smem:[#allocation11_spill]] %s1304_s22  ;;  %s45_s25 = ssub.s32 %s948_s17, %s1304_s22 }
  0x11   : > { %p1047_p3 = por %p57_p2, %p56_p1  ;;  %p42_p4 = scmp.ge.s32.totalorder %s1306_s23, 2 }
  0x12   : > { %p62_p5 = scmp.ne.s32.totalorder %s932_s13, %s928_s12  ;;  %p63_p6 = scmp.eq.s32.totalorder %s529_s20, 0 }
  0x13   : > { %s105_s27 = sadd.s32 1, %s924_s11  ;;  %s1308_s23 = smov (%p42_p4, %s1306_s23), 0 }
  0x14   : > { %1280 = sst [smem:[#allocation12_spill]] %s1308_s23  ;;  %p1055_p7 = por %p63_p6, %p62_p5 }
  0x15   : > { %p115_p8 = scmp.ne.s32.totalorder %s924_s11, %s920_s10  ;;  %s44_s29 = ssub.s32 %s952_s18, %s1308_s23 }
  0x16   : > { %s1281_s28 = scalar_select %p1055_p7, 1, 0 }
  0x17   : > { %p116_p9 = scmp.eq.s32.totalorder %s529_s20, 5  ;;  %s46_s30 = sor.u32 %s45_s25, %s44_s29 }
  0x18   : > { %p103_p10 = scmp.eq.s32.totalorder %s44_s29, 0  ;;  %p47_p11 = scmp.eq.s32.totalorder %s46_s30, 0 }
  0x19   : > { %p1063_p12 = por %p116_p9, %p115_p8  ;;  %p121_p13 = scmp.ne.s32.totalorder %s920_s10, %s916_s9 }
  0x1a   : > { %s1068_s4 = scalar_select %p103_p10, %s924_s11, %s105_s27  }
  0x1b   : > { %s1282_s3 = scalar_select %p1063_p12, 1, 0 }
  0x1c   : > { %s1071_s5 = scalar_select %p47_p11, %s936_s14, %s49_s24  }
  0x1d   : > { %p122_p0 = scmp.eq.s32.totalorder %s530_s21, 5  ;;  %p673_p1 = scmp.lt.s32.totalorder %s956_s19, 6 }
  0x1e   : > { %s1081_s7 = sand.u32 1, %s936_s14   ;;  %s654_s12 = smul.u32 3, %s952_s18 }
  0x1f   : > { %p1076_p2 = por %p122_p0, %p121_p13  ;;  %s533_s8 = sshll.u32 %s1081_s7, 3 }
  0x20   : > { %s146_s20 = scalar_lea.vmem [#allocation2], %s533_s8  ;;  %p1087_p4 = pnand %p673_p1, %p1047_p3 }
  0x21   : > { %s1283_s6 = scalar_select %p1076_p2, 1, 0 }
  0x22   : > { %s155_s25 = sshll.u32 %s146_s20, 4  ;;  %s1092_s21 = sadd.s32 %s948_s17, %s654_s12  ;;  %s1094_s25 = int_to_ptr.vmem [resolvable:$true] %s155_s25 }
  0x23   : > { %s534_s24 = sshll.u32 %s1092_s21, 7  ;;  %s143_s26 = scalar_lea.sflag [#allocation3], %s1081_s7 }
  0x24   : > { %s1100_s23 = scalar_lea.hbm %s1271_s0, %s534_s24  ;;  %p772_p6 = pneg %p1087_p4 }
  0x25   : > { %s770_s8 = scalar_lea.hbm %s1100_s23, 128  ;;  %s775_s29 = scalar_lea.hbm %s1271_s0, 768 }
  0x26   : > { %p771_p5 = scmp.ne.s32.totalorder %s1100_s23, %s770_s8  ;;  %p776_p10 = scmp.lt.u32.totalorder %s1100_s23, %s1271_s0 }
  0x27   : > { %p777_p11 = scmp.lt.u32.totalorder %s775_s29, %s770_s8  ;;  %p779_p0 = scmp.lt.u32.totalorder %s770_s8, %s1100_s23 }
  0x28   : > { %p773_p8 = pnand %p772_p6, %p771_p5 }
  0x29   : > { %p778_p13 = por %p777_p11, %p776_p10 }
  0x2a   : > { %p774_p9 = pneg %p773_p8 }
  0x2b   : > { %p780_p1 = por %p779_p0, %p778_p13 }
  0x2d   : > { %p781_p3 = pnand %p780_p1, %p774_p9 }
  0x2f   : > { %784 = shalt.err (!%p781_p3)
}
  0x30   : > { %s785_s22 = scalar_lea.vmem %s1094_s25, 128  ;;  %s958_s12 = smov [#allocation2]  }
  0x31   : > { %p786_p5 = scmp.ne.s32.totalorder %s1094_s25, %s785_s22  ;;  %s790_s20 = sshll.u32 %s958_s12, 4  ;;  %s791_s20 = int_to_ptr.vmem [resolvable:$false] %s790_s20 }
  0x32   : > { %s792_s24 = scalar_lea.vmem %s791_s20, 256  ;;  %p793_p12 = scmp.lt.s32.totalorder %s1094_s25, %s791_s20 }
  0x33   : > { %p788_p8 = pnand %p786_p5, %p772_p6  ;;  %p794_p10 = scmp.lt.s32.totalorder %s792_s24, %s785_s22 }
  0x35   : > { %p789_p2 = pneg %p788_p8  ;;  %p795_p11 = por %p794_p10, %p793_p12 }
  0x37   : > { %p796_p13 = pnand %p795_p11, %p789_p2 }
  0x39   : > { %799 = shalt.err (!%p796_p13)
}
  0x3a   : > { %665 = dma.hbm_to_vmem [thread:$0]  (!%p1087_p4), %s1100_s23, 128, %s1094_s25, %s143_s26  }
  0x3b   : > { %p179_p3 = scmp.lt.s32.totalorder %s956_s19, 7  ;;  %s535_s8 = sshll.u32 %s1092_s21, 4 }
  0x3c   : > { %p1285_p9 = scmp.ge.s32.totalorder %s956_s19, 1  ;;  %s1140_s12 = scalar_lea.hbm %s1272_s1, %s535_s8 }
  0x3d   : > { %s165_s20 = scalar_lea.vmem [#allocation5], %s1081_s7  ;;  %s163_s23 = scalar_lea.sflag [#allocation6], %s1081_s7 }
  0x3e   : > { %p1133_p0 = pnand %p1285_p9, %p179_p3  ;;  %s174_s24 = sshll.u32 %s165_s20, 4  ;;  %s175_s24 = int_to_ptr.vmem [resolvable:$true] %s174_s24 }
  0x3f   : > { %s800_s25 = scalar_lea.hbm %s1140_s12, 16  ;;  %s805_s22 = scalar_lea.hbm %s1272_s1, 96 }
  0x40   : > { %s1286_s29 = scalar_select %p1133_p0, 1, 0 }
  0x41   : > { %p801_p12 = scmp.ne.s32.totalorder %s1140_s12, %s800_s25  ;;  %p806_p5 = scmp.lt.u32.totalorder %s1140_s12, %s1272_s1 }
  0x42   : > { %p807_p8 = scmp.lt.u32.totalorder %s805_s22, %s800_s25  ;;  %p809_p11 = scmp.lt.u32.totalorder %s800_s25, %s1140_s12 }
  0x43   : > { %p803_p2 = pnand %p801_p12, %p772_p6 }
  0x44   : > { %p808_p10 = por %p807_p8, %p806_p5 }
  0x45   : > { %p804_p1 = pneg %p803_p2 }
  0x46   : > { %p810_p13 = por %p809_p11, %p808_p10 }
  0x48   : > { %p811_p3 = pnand %p810_p13, %p804_p1 }
  0x4a   : > { %814 = shalt.err (!%p811_p3)
}
  0x4b   : > { %s815_s7 = scalar_lea.vmem %s175_s24, 16  ;;  %s959_s20 = smov [#allocation5]  }
  0x4c   : > { %p816_p9 = scmp.ne.s32.totalorder %s175_s24, %s815_s7  ;;  %s820_s21 = sshll.u32 %s959_s20, 4  ;;  %s821_s21 = int_to_ptr.vmem [resolvable:$false] %s820_s21 }
  0x4d   : > { %s822_s26 = scalar_lea.vmem %s821_s21, 32  ;;  %p823_p7 = scmp.lt.s32.totalorder %s175_s24, %s821_s21 }
  0x4e   : > { %p818_p12 = pnand %p816_p9, %p772_p6  ;;  %p824_p0 = scmp.lt.s32.totalorder %s822_s26, %s815_s7 }
  0x50   : > { %p819_p2 = pneg %p818_p12  ;;  %p825_p5 = por %p824_p0, %p823_p7 }
  0x52   : > { %p826_p8 = pnand %p825_p5, %p819_p2 }
  0x54   : > { %829 = shalt.err (!%p826_p8)
}
  0x55   : > { %668 = dma.hbm_to_vmem [thread:$0]  (!%p1087_p4), %s1140_s12, 16, %s175_s24, %s163_s23  }
  0x56   : > { %p1287_p1 = scmp.ne.s32.totalorder %s1286_s29, 0 }
  0x57   : > { %s185_s25 = sand.u32 (!%p1287_p1), 1, %s932_s13   ;;  %p1288_p6 = scmp.ne.s32.totalorder (!%p1287_p1), %s1281_s28, 0 }
  0x58   : > { %183 = sbr.rel (%p1287_p1) target bundleno = 449 (0x1c1), region = 28  ;;  %s537_s22 = sshll.u32 (!%p1287_p1), %s185_s25, 3 }
  0x59   : > { %s186_s8 = scalar_lea.sflag (!%p1287_p1), [#allocation3], %s185_s25  ;;  %s1166_s30 = scalar_lea.vmem (!%p1287_p1), [#allocation2], %s537_s22 }
  0x5f   : > { %903 = dma.done.wait (%p1288_p6), %s186_s8, 128  }
  0x60   : > { %905 = vsyncadd (%p1288_p6), %s186_s8, 4294967168  ;;  %s195_s7 = scalar_lea.sflag [#allocation6], %s185_s25  ;;  %s197_s27 = scalar_lea.vmem [#allocation5], %s185_s25 }
  0x61   : > { %907 = dma.done.wait (%p1288_p6), %s195_s7, 16  }
  0x62   : > { %909 = vsyncadd (%p1288_p6), %s195_s7, 4294967280  ;;  %s219_s29 = sand.u32 1, %s920_s10   ;;  %p539_p7 = scmp.ne.s32.totalorder %s940_s15, 0 }
  0x63   : > { %s538_s12 = sshll.u32 %s219_s29, 3  ;;  %v960_v0 = vmov (!%p539_p7), 0.0  }
  0x64   : > { %s1179_s24 = scalar_lea.vmem [#allocation7], %s538_s12  ;;  %225 = sbr.rel (%p539_p7) target bundleno = 107 (0x6b), region = 40 }
  0x65   : > { %226 = vst [vmem:[%s1179_s24] sm:$0xff] (!%p539_p7), %v960_v0 }
  0x6b PF: > { %v229_v1 = vlaneseq  ;;  %v961_v2 = vmov 0.0|0.0   ;;  %v540_v3 = vld [vmem:[%s197_s27] ss:$0 sm:$0xff]  ;;  %vm962_vm0 = vmmov 0   ;;  %v963_v5 = vmov 0.0   ;;  %p573_p4 = scmp.ne.s32.totalorder %s940_s15, 2 }
  0x6c   : > { %630 = vmatprep.subr.bf16.mxu0 %v961_v2  ;;  %627 = vmatprep.mubr.msk.f32.mxu0 %vm962_vm0, %v963_v5  ;;  %v964_v9 = vmov 1.0|1.0   ;;  %v227_v22 = vld [vmem:[%s1166_s30] sm:$0xff]  ;;  %v316_v23 = vld [vmem:[%s1179_s24] sm:$0xff] }
  0x6d   : > { %v1183_v4 = vshrl.u32 %v229_v1, 7 }
  0x6f   : > { %v231_v6 = vadd.s32 8, %v1183_v4  ;;  %vm268_vm1 = vcmp.eq.s32.totalorder %v1183_v4, %v540_v3  ;;  %v232_v7 = vadd.s32 16, %v1183_v4  ;;  %v233_v8 = vadd.s32 24, %v1183_v4 }
  0x70   : > { %v234_v10 = vadd.s32 32, %v1183_v4  ;;  %v235_v11 = vadd.s32 40, %v1183_v4  ;;  %v236_v12 = vadd.s32 48, %v1183_v4  ;;  %v237_v13 = vadd.s32 56, %v1183_v4 }
  0x71   : > { %vm269_vm2 = vcmp.eq.s32.totalorder %v231_v6, %v540_v3  ;;  %vm270_vm4 = vcmp.eq.s32.totalorder %v232_v7, %v540_v3  ;;  %vm271_vm5 = vcmp.eq.s32.totalorder %v233_v8, %v540_v3  ;;  %v238_v14 = vadd.s32 64, %v1183_v4 }
  0x72   : > { %vm631_vm3 = vmpackc.low %vm269_vm2, %vm268_vm1  ;;  %vm272_vm7 = vcmp.eq.s32.totalorder %v234_v10, %v540_v3  ;;  %vm273_vm8 = vcmp.eq.s32.totalorder %v235_v11, %v540_v3  ;;  %vm274_vm10 = vcmp.eq.s32.totalorder %v236_v12, %v540_v3  ;;  %vm275_vm11 = vcmp.eq.s32.totalorder %v237_v13, %v540_v3 }
  0x73   : > { %632 = vmatpush3.bf16.xpose.msk.msra.mxu0 %vm631_vm3, %v964_v9  ;;  %vm634_vm6 = vmpackc.low %vm271_vm5, %vm270_vm4  ;;  %v239_v15 = vadd.s32 72, %v1183_v4  ;;  %vm276_vm13 = vcmp.eq.s32.totalorder %v238_v14, %v540_v3  ;;  %v240_v16 = vadd.s32 80, %v1183_v4  ;;  %v241_v17 = vadd.s32 88, %v1183_v4 }
  0x74   : > { %633 = vmatprep.subr.bf16.mxu0 %v961_v2  ;;  %vm637_vm9 = vmpackc.low %vm273_vm8, %vm272_vm7  ;;  %v242_v18 = vadd.s32 96, %v1183_v4  ;;  %v243_v19 = vadd.s32 104, %v1183_v4  ;;  %v244_v20 = vadd.s32 112, %v1183_v4  ;;  %v245_v21 = vadd.s32 120, %v1183_v4 }
  0x75   : > { %vm640_vm12 = vmpackc.low %vm275_vm11, %vm274_vm10  ;;  %vm277_vm14 = vcmp.eq.s32.totalorder %v239_v15, %v540_v3  ;;  %vm278_vm0 = vcmp.eq.s32.totalorder %v240_v16, %v540_v3  ;;  %vm279_vm1 = vcmp.eq.s32.totalorder %v241_v17, %v540_v3  ;;  %v401_v32 = vsub.s32 (!%p573_p4), 4, %v1183_v4 }
  0x76   : > { %vm643_vm15 = vmpackc.low %vm277_vm14, %vm276_vm13  ;;  %vm280_vm3 = vcmp.eq.s32.totalorder %v242_v18, %v540_v3  ;;  %vm281_vm4 = vcmp.eq.s32.totalorder %v243_v19, %v540_v3  ;;  %vm283_vm7 = vcmp.eq.s32.totalorder %v245_v21, %v540_v3 }
  0x77   : > { %vm646_vm2 = vmpackc.low %vm279_vm1, %vm278_vm0 }
  0x78   : > { %vm649_vm5 = vmpackc.low %vm281_vm4, %vm280_vm3 }
  0x7b   : > { %635 = vmatpush3.bf16.xpose.msk.msra.mxu0 %vm634_vm6, %v964_v9  ;;  %vm282_vm6 = vcmp.eq.s32.totalorder %v244_v20, %v540_v3 }
  0x7c   : > { %636 = vmatprep.subr.bf16.mxu0 %v961_v2  ;;  %vm652_vm8 = vmpackc.low %vm283_vm7, %vm282_vm6 }
  0x83   : > { %638 = vmatpush3.bf16.xpose.msk.msra.mxu0 %vm637_vm9, %v964_v9 }
  0x84   : > { %639 = vmatprep.subr.bf16.mxu0 %v961_v2 }
  0x8b   : > { %641 = vmatpush3.bf16.xpose.msk.msra.mxu0 %vm640_vm12, %v964_v9 }
  0x8c   : > { %642 = vmatprep.subr.bf16.mxu0 %v961_v2 }
  0x93   : > { %644 = vmatpush3.bf16.xpose.msk.msra.mxu0 %vm643_vm15, %v964_v9 }
  0x94   : > { %645 = vmatprep.subr.bf16.mxu0 %v961_v2 }
  0x9b   : > { %647 = vmatpush3.bf16.xpose.msk.msra.mxu0 %vm646_vm2, %v964_v9 }
  0x9c   : > { %648 = vmatprep.subr.bf16.mxu0 %v961_v2 }
  0xa3   : > { %650 = vmatpush3.bf16.xpose.msk.msra.mxu0 %vm649_vm5, %v964_v9 }
  0xa4   : > { %651 = vmatprep.subr.bf16.mxu0 %v961_v2 }
  0xab   : > { %653 = vmatpush3.bf16.xpose.msk.msra.mxu0 %vm652_vm8, %v964_v9 }
  0xb2   : > { %628 = vmatmul.mubr.f32.vlgmr.msra.gmra.mrb[0].mxu0 %v227_v22 }
 0x182   : > { %392 = sbr.rel (%p573_p4) target bundleno = 424 (0x1a8), region = 44 }
 0x185   : > { %v383_v24 = vpop.f32.mrb[0].mxu0 }
 0x186   : > { %v387_v25 = vadd.f32 %v383_v24, %v316_v23  ;;  %v629_v26 = vpop.f32.mrb[1].mxu0 }
 0x188   : > { %388 = vst [vmem:[%s1179_s24] sm:$0xff] %v387_v25 }
 0x18f   : > { %v393_v27 = vld [vmem:[%s1179_s24] sm:$0xff] }
 0x190   : > { %v394_v28 = vmax.f32 %v393_v27, 1.0 }
 0x192   : > { %768 = vrcp.f32 %v394_v28 }
 0x19c   : > { %v769_v29 = vpop.eup %768 }
 0x19d   : > { %v396_v30 = vmul.f32 %v769_v29, %v394_v28 }
 0x19f   : > { %v397_v31 = vsub.f32 2.0, %v396_v30 }
 0x1a1   : > { %v398_v33 = vmul.f32 %v769_v29, %v397_v31 }
 0x1a3   : > { %v402_v34 = vrot.slane %v398_v33, %v401_v32 }
 0x1a5   : > { %v403_v35 = vmul.f32 %v402_v34, %v393_v27 }
 0x1a7   : > { %404 = vst [vmem:[%s1179_s24] sm:$0xff] %v403_v35 }
 0x1a8 PF: > { %s575_s15 = sshll.u32 %s944_s16, 7  ;;  %s420_s21 = sshll.u32 %s1179_s24, 4  ;;  %s421_s21 = int_to_ptr.vmem [resolvable:$true] %s420_s21 }
 0x1a9   : > { %s1212_s20 = scalar_lea.hbm %s1273_s2, %s575_s15  ;;  %s406_s26 = scalar_lea.sflag [#allocation4], %s219_s29 }
 0x1aa   : > { %s830_s25 = scalar_lea.vmem %s421_s21, 128  ;;  %p1289_p10 = scmp.ne.s32.totalorder %s1282_s3, 0 }
 0x1ab   : > { %p831_p0 = scmp.ne.s32.totalorder %s421_s21, %s830_s25  ;;  %s965_s22 = smov [#allocation7]  }
 0x1ac   : > { %s834_s8 = sshll.u32 %s965_s22, 4  ;;  %s835_s8 = int_to_ptr.vmem [resolvable:$false] %s834_s8 }
 0x1ad   : > { %p832_p11 = pnand %p831_p0, %p1289_p10  ;;  %s836_s30 = scalar_lea.vmem %s835_s8, 256 }
 0x1ae   : > { %p837_p3 = scmp.lt.s32.totalorder %s421_s21, %s835_s8  ;;  %p838_p9 = scmp.lt.s32.totalorder %s836_s30, %s830_s25 }
 0x1af   : > { %p833_p13 = pneg %p832_p11 }
 0x1b0   : > { %p839_p12 = por %p838_p9, %p837_p3 }
 0x1b2   : > { %p840_p2 = pnand %p839_p12, %p833_p13 }
 0x1b4   : > { %843 = shalt.err (!%p840_p2)
}
 0x1b5   : > { %s844_s16 = scalar_lea.hbm %s1212_s20, 128  ;;  %s848_s29 = scalar_lea.hbm %s1273_s2, 256 }
 0x1b6   : > { %p845_p5 = scmp.ne.s32.totalorder %s1212_s20, %s844_s16  ;;  %p849_p6 = scmp.lt.u32.totalorder %s1212_s20, %s1273_s2 }
 0x1b7   : > { %p850_p7 = scmp.lt.u32.totalorder %s848_s29, %s844_s16  ;;  %p852_p0 = scmp.lt.u32.totalorder %s844_s16, %s1212_s20 }
 0x1b8   : > { %p846_p8 = pnand %p845_p5, %p1289_p10 }
 0x1b9   : > { %p851_p4 = por %p850_p7, %p849_p6 }
 0x1ba   : > { %p847_p1 = pneg %p846_p8 }
 0x1bb   : > { %p853_p11 = por %p852_p0, %p851_p4 }
 0x1bd   : > { %p854_p13 = pnand %p853_p11, %p847_p1 }
 0x1bf   : > { %857 = shalt.err (!%p854_p13)
}
 0x1c0   : > { %660 = dma.vmem_to_hbm [thread:$0]  (%p1289_p10), %s421_s21, 128, %s1212_s20, %s406_s26  }
 0x1c1 PF: > { %p674_p3 = scmp.ge.s32.totalorder %s956_s19, 2  ;;  %s432_s15 = sand.u32 1, %s916_s9  }
 0x1c2   : > { %p1290_p9 = scmp.ne.s32.totalorder %s1283_s6, 0  ;;  %s433_s28 = scalar_lea.sflag [#allocation4], %s432_s15 }
 0x1c4   : > { %p670_p12 = pnand %p674_p3, %p1290_p9 }
 0x1c6   : > { %911 = dma.done.wait (!%p670_p12), %s433_s28, 128  }
 0x1c7   : > { %913 = vsyncadd (!%p670_p12), %s433_s28, 4294967168  ;;  %s21_s19 = sadd.s32 1, %s956_s19   ;;  %s1291_s3 = sld [smem:[#allocation11_spill]] }
 0x1c8   : > { %p18_p2 = scmp.ge.s32.totalorder %s21_s19, 8   ;;  %s1292_s23 = sld [smem:[#allocation12_spill]] }
 0x1c9   : > { %s1293_s9 = smov %s920_s10  ;;  %s1294_s10 = smov %s924_s11 }
 0x1ca   : > { %s1295_s11 = smov %s1068_s4  ;;  %s1296_s12 = smov %s932_s13 }
 0x1cb   : > { %s1297_s13 = smov %s936_s14  ;;  %s1298_s14 = smov %s1071_s5 }
 0x1cc   : > { %s1299_s15 = smov %s948_s17  ;;  %s1300_s16 = smov %s952_s18 }
 0x1cd   : > { %s1301_s17 = smov %s1291_s3  ;;  %20 = sbr.rel (!%p18_p2) target bundleno = 11 (0xb), region = 94 }
 0x1ce   : > { %s1302_s18 = smov %s1292_s23 }
 0x1d4   :  { %438 = vsyncpa [#allocation3], 1 }
 0x1d5   :  { %440 = vsyncpa [#allocation3 + $0x1], 1 }
 0x1d6   :  { %441 = vsyncpa [#allocation6], 1 }
 0x1d7   :  { %443 = vsyncpa [#allocation6 + $0x1], 1 }
 0x1d8   :  { %444 = vsyncpa [#allocation4], 1 }
 0x1d9   :  { %446 = vsyncpa [#allocation4 + $0x1], 1 }

</bundles_post_ra>
